<compile_context>
chip_gen: v5e
topology: v5e:2x2
jax: 0.10.0
libtpu: 0.0.40
codegen_flags: <defaults>
</compile_context>

<pallas_src>
import functools

import jax
import jax.numpy as jnp
from jax.experimental import pallas as pl
from jax.experimental.pallas import tpu as pltpu

_MAX_TB = 8192          # batch-tile upper bound (amortizes per-step overhead)
_LANES = 128            # TPU lane width; TB is kept a multiple of this
_MEGACORE_MIN_B = 2048  # force >=2 grid steps above this so v7x's 2 TCs both work


def _round_up(x, m):
    return (x + m - 1) // m * m


def critic_kernel(x_ref, w1_ref, b1_ref, w2_ref, b2_ref, w3_ref, b3_ref, out_ref):
    w1 = w1_ref[...]                                  # (80, 64)
    w2 = w2_ref[...]                                  # (64, 32)
    w3 = w3_ref[...]                                  # (1, 32)
    x = x_ref[...]                                    # (TB, 80)

    h1 = jnp.dot(x.astype(w1.dtype), w1, preferred_element_type=jnp.float32) + b1_ref[...]
    h1 = jnp.maximum(h1, 0.0)                         # (TB, 64)
    h2 = jnp.dot(h1.astype(w2.dtype), w2, preferred_element_type=jnp.float32) + b2_ref[...]
    h2 = jnp.maximum(h2, 0.0)                         # (TB, 32)

    # Final layer has out_features == 1: do it on the VPU/XLU (multiply + lane
    # reduce) instead of a near-empty MXU matmul.
    if out_ref.shape[-1] == 1:
        # Fallback layout: (TB, 1) column (masked stores, always lowers).
        v = jnp.sum(h2 * w3, axis=-1, keepdims=True) + b3_ref[...]
    else:
        # Lane-dense layout: fold the batch tile onto (sublane, lane) so the
        # store is an unmasked full-128-lane vst.
        k, lanes = out_ref.shape                      # (TB//128, 128)
        h2f = h2.reshape(k, lanes, h2.shape[-1])      # sublane-split only; minor dim kept
        v = jnp.sum(h2f * w3, axis=-1) + b3_ref[...]  # (k, 128)
    out_ref[...] = v.astype(out_ref.dtype)


def prepare_critic_params(params, dtype=jnp.float32):
    """One-time conversion from PyTorch nn.Linear (out,in) layout to kernel layout.

    dtype=jnp.bfloat16 halves the matmul-input width (bias add / accumulation /
    output stay f32) but loosens accuracy below the 1e-5 test tolerance; to also
    halve the dominant HBM stream the caller should pass bf16 `state`.
    """
    w1, b1, w2, b2, w3, b3 = params
    return (
        jnp.asarray(w1).T.astype(dtype),               # (80, 64)
        jnp.asarray(b1, jnp.float32).reshape(1, -1),   # (1, 64)
        jnp.asarray(w2).T.astype(dtype),               # (64, 32)
        jnp.asarray(b2, jnp.float32).reshape(1, -1),   # (1, 32)
        jnp.asarray(w3).reshape(1, -1).astype(dtype),  # (1, 32)  (out_features = 1)
        jnp.asarray(b3, jnp.float32).reshape(1, 1),    # (1, 1)
    )


@functools.partial(jax.jit, static_argnames=("lane_dense",))
def _critic_forward(state, prepared_params, *, lane_dense=True):
    w1t, b1r, w2t, b2r, w3r, b3r = prepared_params
    B, F = state.shape

    # Tile selection: tiles up to _MAX_TB amortize per-step overhead; >=2 steps
    # for large batches so the "parallel" axis can split across v7x TensorCores;
    # 128-alignment keeps the folded output exactly lane-shaped while capping
    # ragged-batch padding waste at <128 rows per tile (vs up to TB-1 before).
    grid = pl.cdiv(B, _MAX_TB)
    if B >= _MEGACORE_MIN_B:
        grid = max(grid, 2)
    TB = _round_up(pl.cdiv(B, grid), _LANES)
    Bp = grid * TB

    x = state if Bp == B else jnp.pad(state, ((0, Bp - B), (0, 0)))

    # Full-array blocks with constant index_map -> DMA'd once, VMEM-resident.
    resident = lambda a: pl.BlockSpec(a.shape, lambda i: (0, 0))

    if lane_dense:
        out_shape = jax.ShapeDtypeStruct((grid, TB // _LANES, _LANES), jnp.float32)
        out_spec = pl.BlockSpec((None, TB // _LANES, _LANES), lambda i: (i, 0, 0))
    else:
        out_shape = jax.ShapeDtypeStruct((Bp, 1), jnp.float32)
        out_spec = pl.BlockSpec((TB, 1), lambda i: (i, 0))

    param_bytes = sum(int(p.size) * p.dtype.itemsize for p in prepared_params)
    cost = pl.CostEstimate(
        flops=2 * Bp * (80 * 64 + 64 * 32 + 32),
        transcendentals=0,
        bytes_accessed=Bp * (F * state.dtype.itemsize + 4) + param_bytes,
    )

    out = pl.pallas_call(
        critic_kernel,
        out_shape=out_shape,
        grid=(grid,),
        in_specs=[
            # Streamed batch tile, auto double-buffered by the pipeline.
            # (Raise to pipeline_mode=pl.Buffered(3) only if xprof still shows
            #  exposed DMA after the larger tiles.)
            pl.BlockSpec((TB, F), lambda i: (i, 0)),
            resident(w1t), resident(b1r),
            resident(w2t), resident(b2r),
            resident(w3r), resident(b3r),
        ],
        out_specs=out_spec,
        compiler_params=pltpu.CompilerParams(
            dimension_semantics=("parallel",),       # megacore split on v7x
            vmem_limit_bytes=32 * 1024 * 1024,       # portable (v5e default is 16 MiB)
        ),
        cost_estimate=cost,
    )(x, w1t, b1r, w2t, b2r, w3r, b3r)

    out = out.reshape(Bp, 1)                          # free, contiguous
    return out[:B] if Bp != B else out


_LANE_DENSE_OK = None


def critic_forward(state, prepared_params):
    """state: (B, 80) -> value: (B, 1) float32.

    Tries the lane-dense output layout first and falls back to the plain (TB,1)
    layout if the in-kernel fold does not lower on this jax/libtpu version.
    """
    global _LANE_DENSE_OK
    if _LANE_DENSE_OK is None:
        try:
            out = _critic_forward(state, prepared_params, lane_dense=True)
            jax.block_until_ready(out)
            _LANE_DENSE_OK = True
            return out
        except Exception:
            _LANE_DENSE_OK = False
    return _critic_forward(state, prepared_params, lane_dense=_LANE_DENSE_OK)


def init_params(key):
    """Deterministic init mimicking PyTorch nn.Linear default (uniform +/-1/sqrt(fan_in))."""
    dims = [(80, 64), (64, 32), (32, 1)]
    params = []
    for fan_in, fan_out in dims:
        kw, kb, key = jax.random.split(key, 3)
        bound = 1.0 / jnp.sqrt(float(fan_in))
        # PyTorch Linear weight layout: (out_features, in_features)
        w = jax.random.uniform(kw, (fan_out, fan_in), jnp.float32, -bound, bound)
        b = jax.random.uniform(kb, (fan_out,), jnp.float32, -bound, bound)
        params.extend([w, b])
    return tuple(params)


if __name__ == "__main__":
    key = jax.random.PRNGKey(0)
    k_state, k_params = jax.random.split(key)

    params = init_params(k_params)
    w1, b1, w2, b2, w3, b3 = params
    prepared = prepare_critic_params(params)

    def ref_fn(s):
        h1 = jnp.maximum(s @ w1.T + b1, 0.0)
        h2 = jnp.maximum(h1 @ w2.T + b2, 0.0)
        return h2 @ w3.T + b3

    # f32 path: exact vs reference. Covers tiny batch (8), ragged batch (37),
    # and a multi-step grid with megacore split + padding (2500 -> grid=2, TB=1280).
    for B in (8, 37, 2500):
        state = jax.random.normal(jax.random.fold_in(k_state, B), (B, 80), jnp.float32)
        value = critic_forward(state, prepared)
        jax.block_until_ready(value)
        assert value.shape == (B, 1), value.shape
        assert value.dtype == jnp.float32, value.dtype
        assert jnp.allclose(value, ref_fn(state), atol=1e-5, rtol=1e-5)

    # Optional bf16 matmul-input path (looser tolerance by construction).
    prepared_bf16 = prepare_critic_params(params, dtype=jnp.bfloat16)
    state = jax.random.normal(jax.random.fold_in(k_state, 64), (64, 80), jnp.float32)
    v16 = critic_forward(state, prepared_bf16)
    jax.block_until_ready(v16)
    assert v16.shape == (64, 1), v16.shape
    assert jnp.allclose(v16, ref_fn(state), atol=5e-2, rtol=5e-2)

    print("KERNEL_OK")
</pallas_src>

<mosaic_0001>
module attributes {stable_mosaic.version = 11 : i64} {
  func.func @critic_kernel(%arg0: i32, %arg1: memref<128x80xf32, #tpu.memory_space<vmem>>, %arg2: memref<80x64xf32, #tpu.memory_space<vmem>>, %arg3: memref<1x64xf32, #tpu.memory_space<vmem>>, %arg4: memref<64x32xf32, #tpu.memory_space<vmem>>, %arg5: memref<1x32xf32, #tpu.memory_space<vmem>>, %arg6: memref<1x32xf32, #tpu.memory_space<vmem>>, %arg7: memref<1x1xf32, #tpu.memory_space<vmem>>, %arg8: memref<1x1x128xf32, #tpu.memory_space<vmem>>) attributes {dimension_semantics = [#tpu.dimension_semantics<parallel>], iteration_bounds = array<i64: 1>, scalar_prefetch = 0 : i64, scratch_operands = 0 : i64, tpu.core_type = #tpu.core_type<tc>, window_params = [{transform_indices = @transform_0, window_bounds = array<i64: 128, 80>}, {pipeline_mode = #tpu.pipeline_mode<synchronous>, transform_indices = @transform_1, window_bounds = array<i64: 80, 64>}, {pipeline_mode = #tpu.pipeline_mode<synchronous>, transform_indices = @transform_2, window_bounds = array<i64: 1, 64>}, {pipeline_mode = #tpu.pipeline_mode<synchronous>, transform_indices = @transform_3, window_bounds = array<i64: 64, 32>}, {pipeline_mode = #tpu.pipeline_mode<synchronous>, transform_indices = @transform_4, window_bounds = array<i64: 1, 32>}, {pipeline_mode = #tpu.pipeline_mode<synchronous>, transform_indices = @transform_5, window_bounds = array<i64: 1, 32>}, {pipeline_mode = #tpu.pipeline_mode<synchronous>, transform_indices = @transform_6, window_bounds = array<i64: 1, 1>}, {transform_indices = @transform_7, window_bounds = array<i64: 1, 1, 128>}]} {
    %c0 = arith.constant 0 : index
    %c0_0 = arith.constant 0 : index
    %0 = vector.load %arg2[%c0, %c0_0] : memref<80x64xf32, #tpu.memory_space<vmem>>, vector<80x64xf32>
    %c0_1 = arith.constant 0 : index
    %c0_2 = arith.constant 0 : index
    %1 = vector.load %arg4[%c0_1, %c0_2] : memref<64x32xf32, #tpu.memory_space<vmem>>, vector<64x32xf32>
    %c0_3 = arith.constant 0 : index
    %c0_4 = arith.constant 0 : index
    %2 = vector.load %arg6[%c0_3, %c0_4] : memref<1x32xf32, #tpu.memory_space<vmem>>, vector<1x32xf32>
    %c0_5 = arith.constant 0 : index
    %c0_6 = arith.constant 0 : index
    %3 = vector.load %arg1[%c0_5, %c0_6] : memref<128x80xf32, #tpu.memory_space<vmem>>, vector<128x80xf32>
    %cst = arith.constant dense<0.000000e+00> : vector<128x64xf32>
    %4 = tpu.matmul %3, %0, %cst {dimension_numbers = #tpu.dot_dimension_numbers<[1], [0], [0], [1], [0, 0, 1, 1], [], []>} : vector<128x80xf32>, vector<80x64xf32>, vector<128x64xf32> -> vector<128x64xf32>
    %c0_7 = arith.constant 0 : index
    %c0_8 = arith.constant 0 : index
    %5 = vector.load %arg3[%c0_7, %c0_8] : memref<1x64xf32, #tpu.memory_space<vmem>>, vector<1x64xf32>
    %6 = vector.broadcast %5 : vector<1x64xf32> to vector<128x64xf32>
    %7 = arith.addf %4, %6 : vector<128x64xf32>
    %cst_9 = arith.constant 0.000000e+00 : f32
    %8 = vector.broadcast %cst_9 : f32 to vector<128x64xf32>
    %9 = arith.maximumf %7, %8 : vector<128x64xf32>
    %cst_10 = arith.constant dense<0.000000e+00> : vector<128x32xf32>
    %10 = tpu.matmul %9, %1, %cst_10 {dimension_numbers = #tpu.dot_dimension_numbers<[1], [0], [0], [1], [0, 0, 1, 1], [], []>} : vector<128x64xf32>, vector<64x32xf32>, vector<128x32xf32> -> vector<128x32xf32>
    %c0_11 = arith.constant 0 : index
    %c0_12 = arith.constant 0 : index
    %11 = vector.load %arg5[%c0_11, %c0_12] : memref<1x32xf32, #tpu.memory_space<vmem>>, vector<1x32xf32>
    %12 = vector.broadcast %11 : vector<1x32xf32> to vector<128x32xf32>
    %13 = arith.addf %10, %12 : vector<128x32xf32>
    %cst_13 = arith.constant 0.000000e+00 : f32
    %14 = vector.broadcast %cst_13 : f32 to vector<128x32xf32>
    %15 = arith.maximumf %13, %14 : vector<128x32xf32>
    %16 = vector.shape_cast %15 : vector<128x32xf32> to vector<1x128x32xf32>
    %17 = vector.shape_cast %2 : vector<1x32xf32> to vector<1x1x32xf32>
    %18 = vector.broadcast %17 : vector<1x1x32xf32> to vector<1x128x32xf32>
    %19 = arith.mulf %16, %18 : vector<1x128x32xf32>
    %cst_14 = arith.constant dense<0.000000e+00> : vector<1x128xf32>
    %20 = vector.multi_reduction <add>, %19, %cst_14 [2] : vector<1x128x32xf32> to vector<1x128xf32>
    %c0_15 = arith.constant 0 : index
    %c0_16 = arith.constant 0 : index
    %21 = vector.load %arg7[%c0_15, %c0_16] : memref<1x1xf32, #tpu.memory_space<vmem>>, vector<1x1xf32>
    %22 = vector.broadcast %21 : vector<1x1xf32> to vector<1x128xf32>
    %23 = arith.addf %20, %22 : vector<1x128xf32>
    %c0_17 = arith.constant 0 : index
    %c0_18 = arith.constant 0 : index
    %c0_19 = arith.constant 0 : index
    %24 = vector.load %arg8[%c0_17, %c0_18, %c0_19] : memref<1x1x128xf32, #tpu.memory_space<vmem>>, vector<1x1x128xf32>
    %25 = vector.shape_cast %24 : vector<1x1x128xf32> to vector<1x128xf32>
    %26 = vector.shape_cast %23 : vector<1x128xf32> to vector<1x1x128xf32>
    tpu.vector_store %arg8[%c0_17, %c0_18, %c0_19], %26 {strides = array<i32>} : memref<1x1x128xf32, #tpu.memory_space<vmem>>, vector<1x1x128xf32>,
    return
  }
  func.func @transform_0(%arg0: i32) -> (i32, i32) {
    %c0_i32 = arith.constant 0 : i32
    %c0_i32_0 = arith.constant 0 : i32
    return %arg0, %c0_i32 : i32, i32
  }
  func.func @transform_1(%arg0: i32) -> (i32, i32) {
    %c0_i32 = arith.constant 0 : i32
    %c0_i32_0 = arith.constant 0 : i32
    %c0_i32_1 = arith.constant 0 : i32
    return %c0_i32, %c0_i32_0 : i32, i32
  }
  func.func @transform_2(%arg0: i32) -> (i32, i32) {
    %c0_i32 = arith.constant 0 : i32
    %c0_i32_0 = arith.constant 0 : i32
    %c0_i32_1 = arith.constant 0 : i32
    return %c0_i32, %c0_i32_0 : i32, i32
  }
  func.func @transform_3(%arg0: i32) -> (i32, i32) {
    %c0_i32 = arith.constant 0 : i32
    %c0_i32_0 = arith.constant 0 : i32
    %c0_i32_1 = arith.constant 0 : i32
    return %c0_i32, %c0_i32_0 : i32, i32
  }
  func.func @transform_4(%arg0: i32) -> (i32, i32) {
    %c0_i32 = arith.constant 0 : i32
    %c0_i32_0 = arith.constant 0 : i32
    %c0_i32_1 = arith.constant 0 : i32
    return %c0_i32, %c0_i32_0 : i32, i32
  }
  func.func @transform_5(%arg0: i32) -> (i32, i32) {
    %c0_i32 = arith.constant 0 : i32
    %c0_i32_0 = arith.constant 0 : i32
    %c0_i32_1 = arith.constant 0 : i32
    return %c0_i32, %c0_i32_0 : i32, i32
  }
  func.func @transform_6(%arg0: i32) -> (i32, i32) {
    %c0_i32 = arith.constant 0 : i32
    %c0_i32_0 = arith.constant 0 : i32
    %c0_i32_1 = arith.constant 0 : i32
    return %c0_i32, %c0_i32_0 : i32, i32
  }
  func.func @transform_7(%arg0: i32) -> (i32, i32, i32) {
    %c0_i32 = arith.constant 0 : i32
    %c0_i32_0 = arith.constant 0 : i32
    %c0_i32_1 = arith.constant 0 : i32
    return %arg0, %c0_i32, %c0_i32_0 : i32, i32, i32
  }
}

module attributes {stable_mosaic.version = 11 : i64} {
  func.func @critic_kernel(%arg0: i32, %arg1: memref<128x80xf32, #tpu.memory_space<vmem>>, %arg2: memref<80x64xf32, #tpu.memory_space<vmem>>, %arg3: memref<1x64xf32, #tpu.memory_space<vmem>>, %arg4: memref<64x32xf32, #tpu.memory_space<vmem>>, %arg5: memref<1x32xf32, #tpu.memory_space<vmem>>, %arg6: memref<1x32xf32, #tpu.memory_space<vmem>>, %arg7: memref<1x1xf32, #tpu.memory_space<vmem>>, %arg8: memref<128x1xf32, #tpu.memory_space<vmem>>) attributes {dimension_semantics = [#tpu.dimension_semantics<parallel>], iteration_bounds = array<i64: 1>, scalar_prefetch = 0 : i64, scratch_operands = 0 : i64, tpu.core_type = #tpu.core_type<tc>, window_params = [{transform_indices = @transform_0, window_bounds = array<i64: 128, 80>}, {pipeline_mode = #tpu.pipeline_mode<synchronous>, transform_indices = @transform_1, window_bounds = array<i64: 80, 64>}, {pipeline_mode = #tpu.pipeline_mode<synchronous>, transform_indices = @transform_2, window_bounds = array<i64: 1, 64>}, {pipeline_mode = #tpu.pipeline_mode<synchronous>, transform_indices = @transform_3, window_bounds = array<i64: 64, 32>}, {pipeline_mode = #tpu.pipeline_mode<synchronous>, transform_indices = @transform_4, window_bounds = array<i64: 1, 32>}, {pipeline_mode = #tpu.pipeline_mode<synchronous>, transform_indices = @transform_5, window_bounds = array<i64: 1, 32>}, {pipeline_mode = #tpu.pipeline_mode<synchronous>, transform_indices = @transform_6, window_bounds = array<i64: 1, 1>}, {transform_indices = @transform_7, window_bounds = array<i64: 128, 1>}]} {
    %c0 = arith.constant 0 : index
    %c0_0 = arith.constant 0 : index
    %0 = vector.load %arg2[%c0, %c0_0] : memref<80x64xf32, #tpu.memory_space<vmem>>, vector<80x64xf32>
    %c0_1 = arith.constant 0 : index
    %c0_2 = arith.constant 0 : index
    %1 = vector.load %arg4[%c0_1, %c0_2] : memref<64x32xf32, #tpu.memory_space<vmem>>, vector<64x32xf32>
    %c0_3 = arith.constant 0 : index
    %c0_4 = arith.constant 0 : index
    %2 = vector.load %arg6[%c0_3, %c0_4] : memref<1x32xf32, #tpu.memory_space<vmem>>, vector<1x32xf32>
    %c0_5 = arith.constant 0 : index
    %c0_6 = arith.constant 0 : index
    %3 = vector.load %arg1[%c0_5, %c0_6] : memref<128x80xf32, #tpu.memory_space<vmem>>, vector<128x80xf32>
    %cst = arith.constant dense<0.000000e+00> : vector<128x64xf32>
    %4 = tpu.matmul %3, %0, %cst {dimension_numbers = #tpu.dot_dimension_numbers<[1], [0], [0], [1], [0, 0, 1, 1], [], []>} : vector<128x80xf32>, vector<80x64xf32>, vector<128x64xf32> -> vector<128x64xf32>
    %c0_7 = arith.constant 0 : index
    %c0_8 = arith.constant 0 : index
    %5 = vector.load %arg3[%c0_7, %c0_8] : memref<1x64xf32, #tpu.memory_space<vmem>>, vector<1x64xf32>
    %6 = vector.broadcast %5 : vector<1x64xf32> to vector<128x64xf32>
    %7 = arith.addf %4, %6 : vector<128x64xf32>
    %cst_9 = arith.constant 0.000000e+00 : f32
    %8 = vector.broadcast %cst_9 : f32 to vector<128x64xf32>
    %9 = arith.maximumf %7, %8 : vector<128x64xf32>
    %cst_10 = arith.constant dense<0.000000e+00> : vector<128x32xf32>
    %10 = tpu.matmul %9, %1, %cst_10 {dimension_numbers = #tpu.dot_dimension_numbers<[1], [0], [0], [1], [0, 0, 1, 1], [], []>} : vector<128x64xf32>, vector<64x32xf32>, vector<128x32xf32> -> vector<128x32xf32>
    %c0_11 = arith.constant 0 : index
    %c0_12 = arith.constant 0 : index
    %11 = vector.load %arg5[%c0_11, %c0_12] : memref<1x32xf32, #tpu.memory_space<vmem>>, vector<1x32xf32>
    %12 = vector.broadcast %11 : vector<1x32xf32> to vector<128x32xf32>
    %13 = arith.addf %10, %12 : vector<128x32xf32>
    %cst_13 = arith.constant 0.000000e+00 : f32
    %14 = vector.broadcast %cst_13 : f32 to vector<128x32xf32>
    %15 = arith.maximumf %13, %14 : vector<128x32xf32>
    %16 = vector.broadcast %2 : vector<1x32xf32> to vector<128x32xf32>
    %17 = arith.mulf %15, %16 : vector<128x32xf32>
    %cst_14 = arith.constant dense<0.000000e+00> : vector<128xf32>
    %18 = vector.multi_reduction <add>, %17, %cst_14 [1] : vector<128x32xf32> to vector<128xf32>
    %19 = vector.shape_cast %18 : vector<128xf32> to vector<128x1xf32>
    %c0_15 = arith.constant 0 : index
    %c0_16 = arith.constant 0 : index
    %20 = vector.load %arg7[%c0_15, %c0_16] : memref<1x1xf32, #tpu.memory_space<vmem>>, vector<1x1xf32>
    %21 = vector.broadcast %20 : vector<1x1xf32> to vector<128x1xf32>
    %22 = arith.addf %19, %21 : vector<128x1xf32>
    %c0_17 = arith.constant 0 : index
    %c0_18 = arith.constant 0 : index
    %23 = vector.load %arg8[%c0_17, %c0_18] : memref<128x1xf32, #tpu.memory_space<vmem>>, vector<128x1xf32>
    tpu.vector_store %arg8[%c0_17, %c0_18], %22 {strides = array<i32>} : memref<128x1xf32, #tpu.memory_space<vmem>>, vector<128x1xf32>,
    return
  }
  func.func @transform_0(%arg0: i32) -> (i32, i32) {
    %c0_i32 = arith.constant 0 : i32
    %c0_i32_0 = arith.constant 0 : i32
    return %arg0, %c0_i32 : i32, i32
  }
  func.func @transform_1(%arg0: i32) -> (i32, i32) {
    %c0_i32 = arith.constant 0 : i32
    %c0_i32_0 = arith.constant 0 : i32
    %c0_i32_1 = arith.constant 0 : i32
    return %c0_i32, %c0_i32_0 : i32, i32
  }
  func.func @transform_2(%arg0: i32) -> (i32, i32) {
    %c0_i32 = arith.constant 0 : i32
    %c0_i32_0 = arith.constant 0 : i32
    %c0_i32_1 = arith.constant 0 : i32
    return %c0_i32, %c0_i32_0 : i32, i32
  }
  func.func @transform_3(%arg0: i32) -> (i32, i32) {
    %c0_i32 = arith.constant 0 : i32
    %c0_i32_0 = arith.constant 0 : i32
    %c0_i32_1 = arith.constant 0 : i32
    return %c0_i32, %c0_i32_0 : i32, i32
  }
  func.func @transform_4(%arg0: i32) -> (i32, i32) {
    %c0_i32 = arith.constant 0 : i32
    %c0_i32_0 = arith.constant 0 : i32
    %c0_i32_1 = arith.constant 0 : i32
    return %c0_i32, %c0_i32_0 : i32, i32
  }
  func.func @transform_5(%arg0: i32) -> (i32, i32) {
    %c0_i32 = arith.constant 0 : i32
    %c0_i32_0 = arith.constant 0 : i32
    %c0_i32_1 = arith.constant 0 : i32
    return %c0_i32, %c0_i32_0 : i32, i32
  }
  func.func @transform_6(%arg0: i32) -> (i32, i32) {
    %c0_i32 = arith.constant 0 : i32
    %c0_i32_0 = arith.constant 0 : i32
    %c0_i32_1 = arith.constant 0 : i32
    return %c0_i32, %c0_i32_0 : i32, i32
  }
  func.func @transform_7(%arg0: i32) -> (i32, i32) {
    %c0_i32 = arith.constant 0 : i32
    %c0_i32_0 = arith.constant 0 : i32
    return %arg0, %c0_i32 : i32, i32
  }
}

</mosaic_0001>

<bundles_post_ra>
// kernel: _critic_forward.1
= control target key start
LH: loop header
LB: loop body
LE: loop exit
PB: predicated region body
PF: predicated region fallthrough
CT: control target
= control target key end

     0   :  { %vm67_vm0 = vcmask 654336   ;;  %vm201_vm1 = vcmask 523264   ;;  %v562_v62 = vmov 0   ;;  %vm350_vm2 = vcmask 261120   ;;  %s858_s1 = inlined_call_operand.vmem [shape: f32[80,64], index: 1, kind: input, shape index: {}]   ;;  %s859_s2 = inlined_call_operand.vmem [shape: f32[1,64], index: 2, kind: input, shape index: {}]   ;;  %s860_s0 = inlined_call_operand.vmem [shape: f32[128,80], index: 0, kind: input, shape index: {}]   ;;  %s861_s3 = inlined_call_operand.vmem [shape: f32[64,32], index: 3, kind: input, shape index: {}]   ;;  %s862_s4 = inlined_call_operand.vmem [shape: f32[1,32], index: 4, kind: input, shape index: {}]   ;;  %s863_s5 = inlined_call_operand.vmem [shape: f32[1,32], index: 5, kind: input, shape index: {}]   ;;  %s864_s6 = inlined_call_operand.<no memory space> [shape: f32[1,1], index: 6, kind: input, shape index: {}]   ;;  %s865_s7 = inlined_call_operand.vmem [shape: f32[1,1,128], index: 7, kind: output, shape index: {}]  }
   0x1   :  { %v37_v0 = vld [vmem:[%s858_s1 + $0x48] sm:$0xff]  ;;  %v36_v1 = vld [vmem:[%s858_s1 + $0x40] sm:$0xff]  ;;  %v35_v2 = vld [vmem:[%s858_s1 + $0x38] sm:$0xff]  ;;  %v12_v60 = vstv %s864_s6  ;;  %558 = vset.pattern.permute.xlu0 %v562_v62  ;;  %vm443_vm3 = vcmask 130112   ;;  %vm447_vm4 = vcmask 195712   ;;  %vm451_vm5 = vcmask 261312  }
   0x2   :  { %122 = vmatpush.msra.mxu0 %v37_v0  ;;  %539 = vmatpush.msra.mxu2 %v37_v0  ;;  %v34_v3 = vld [vmem:[%s858_s1 + $0x30] sm:$0xff]  ;;  %v33_v4 = vld [vmem:[%s858_s1 + $0x28] sm:$0xff]  ;;  %v32_v5 = vld [vmem:[%s858_s1 + $0x20] sm:$0xff]  ;;  %13 = vst [vmem:[#allocation2] sm:$0x1] %v12_v60  ;;  %vm455_vm6 = vcmask 326912  }
   0x3   :  { %v31_v6 = vld [vmem:[%s858_s1 + $0x18] sm:$0xff]  ;;  %v30_v7 = vld [vmem:[%s858_s1 + $0x10] sm:$0xff]  ;;  %v29_v8 = vld [vmem:[%s858_s1 + $0x8] sm:$0xff]  ;;  %vm459_vm7 = vcmask 392512   ;;  %vm463_vm8 = vcmask 458112   ;;  %vm467_vm9 = vcmask 523712  }
   0x4   :  { %123 = vmatpush.msra.mxu0 %v36_v1  ;;  %540 = vmatpush.msra.mxu2 %v36_v1  ;;  %v28_v9 = vld [vmem:[%s858_s1] sm:$0xff]  ;;  %v48_v12 = vld [vmem:[%s860_s0 + $0x8] sm:$0xff]  ;;  %v49_v14 = vld [vmem:[%s860_s0 + $0x10] sm:$0xff]  ;;  %vm471_vm10 = vcmask 589312   ;;  %vm475_vm11 = vcmask 654912   ;;  %vm479_vm12 = vcmask 720512  }
   0x5   :  { %v47_v10 = vld [vmem:[%s860_s0] sm:$0xff]  ;;  %v56_v13 = vld [vmem:[%s860_s0 + $0x48] sm:$0xff]  ;;  %v57_v15 = vld [vmem:[%s860_s0 + $0x50] sm:$0xff]  ;;  %vm483_vm13 = vcmask 786112   ;;  %vm487_vm14 = vcmask 851712   ;;  %vm491_vm15 = vcmask 917312  }
   0x6   :  { %124 = vmatpush.msra.mxu0 %v35_v2  ;;  %541 = vmatpush.msra.mxu2 %v35_v2  ;;  %v55_v11 = vld [vmem:[%s860_s0 + $0x40] sm:$0xff]  ;;  %v50_v16 = vld [vmem:[%s860_s0 + $0x18] sm:$0xff]  ;;  %v44_v19 = vld [vmem:[%s861_s3 + $0x30] sm:$0xff] }
   0x7   :  { %v58_v17 = vld [vmem:[%s860_s0 + $0x58] sm:$0xff]  ;;  %v43_v20 = vld [vmem:[%s861_s3 + $0x28] sm:$0xff]  ;;  %v42_v21 = vld [vmem:[%s861_s3 + $0x20] sm:$0xff] }
   0x8   :  { %125 = vmatpush.msra.mxu0 %v34_v3  ;;  %542 = vmatpush.msra.mxu2 %v34_v3  ;;  %v45_v18 = vld [vmem:[%s861_s3 + $0x38] sm:$0xff]  ;;  %v51_v22 = vld [vmem:[%s860_s0 + $0x20] sm:$0xff]  ;;  %v52_v25 = vld [vmem:[%s860_s0 + $0x28] sm:$0xff] }
   0x9   :  { %258 = vmatpush.msra.mxu1 %v45_v18  ;;  %549 = vmatpush.msra.mxu3 %v45_v18  ;;  %v59_v23 = vld [vmem:[%s860_s0 + $0x60] sm:$0xff]  ;;  %v41_v24 = vld [vmem:[%s861_s3 + $0x18] sm:$0xff]  ;;  %v60_v26 = vld [vmem:[%s860_s0 + $0x68] sm:$0xff] }
   0xa   :  { %126 = vmatpush.msra.mxu0 %v33_v4  ;;  %543 = vmatpush.msra.mxu2 %v33_v4  ;;  %v53_v27 = vld [vmem:[%s860_s0 + $0x30] sm:$0xff]  ;;  %v54_v29 = vld [vmem:[%s860_s0 + $0x38] sm:$0xff]  ;;  %v39_v32 = vld [vmem:[%s861_s3 + $0x8] sm:$0xff] }
   0xb   :  { %259 = vmatpush.msra.mxu1 %v44_v19  ;;  %550 = vmatpush.msra.mxu3 %v44_v19  ;;  %v61_v28 = vld [vmem:[%s860_s0 + $0x70] sm:$0xff]  ;;  %v62_v30 = vld [vmem:[%s860_s0 + $0x78] sm:$0xff]  ;;  %v38_v33 = vld [vmem:[%s861_s3] sm:$0xff] }
   0xc   :  { %127 = vmatpush.msra.mxu0 %v32_v5  ;;  %544 = vmatpush.msra.mxu2 %v32_v5  ;;  %v40_v31 = vld [vmem:[%s861_s3 + $0x10] sm:$0xff]  ;;  %v724_v34 = vld [vmem:[%s859_s2] ss:$0 sm:$0xff] }
   0xd   :  { %260 = vmatpush.msra.mxu1 %v43_v20  ;;  %551 = vmatpush.msra.mxu3 %v43_v20  ;;  %v399_v4 = vld [vmem:[#allocation2] sm:$0x1] }
   0xe   :  { %128 = vmatpush.msra.mxu0 %v31_v6  ;;  %545 = vmatpush.msra.mxu2 %v31_v6 }
   0xf   :  { %261 = vmatpush.msra.mxu1 %v42_v21  ;;  %552 = vmatpush.msra.mxu3 %v42_v21 }
  0x10   :  { %129 = vmatpush.msra.mxu0 %v30_v7  ;;  %546 = vmatpush.msra.mxu2 %v30_v7 }
  0x11   :  { %262 = vmatpush.msra.mxu1 %v41_v24  ;;  %553 = vmatpush.msra.mxu3 %v41_v24 }
  0x12   :  { %130 = vmatpush.msra.mxu0 %v29_v8  ;;  %547 = vmatpush.msra.mxu2 %v29_v8 }
  0x13   :  { %263 = vmatpush.msra.mxu1 %v40_v31  ;;  %554 = vmatpush.msra.mxu3 %v40_v31 }
  0x14   :  { %131 = vmatpush.msra.mxu0 %v28_v9  ;;  %548 = vmatpush.msra.mxu2 %v28_v9 }
  0x15   :  { %507 = vmatmul.msk.f32.vlgmr.msra.gmra.mxu0 %vm67_vm0, %v47_v10  ;;  %515 = vmatmul.msk.f32.vlgmr.msra.gmra.mxu2 %vm67_vm0, %v55_v11 }
  0x16   :  { %264 = vmatpush.msra.mxu1 %v39_v32  ;;  %555 = vmatpush.msra.mxu3 %v39_v32 }
  0x17   :  { %402 = vperm.xlu0 %558, %v399_v4  }
  0x18   :  { %265 = vmatpush.msra.mxu1 %v38_v33  ;;  %556 = vmatpush.msra.mxu3 %v38_v33 }
  0x1d   :  { %508 = vmatmul.msk.f32.gmra.mxu0 %vm67_vm0, %v48_v12  ;;  %516 = vmatmul.msk.f32.gmra.mxu2 %vm67_vm0, %v56_v13 }
  0x25   :  { %509 = vmatmul.msk.f32.gmra.mxu0 %vm67_vm0, %v49_v14  ;;  %517 = vmatmul.msk.f32.gmra.mxu2 %vm67_vm0, %v57_v15 }
  0x2d   :  { %510 = vmatmul.msk.f32.gmra.mxu0 %vm67_vm0, %v50_v16  ;;  %518 = vmatmul.msk.f32.gmra.mxu2 %vm67_vm0, %v58_v17 }
  0x35   :  { %511 = vmatmul.msk.f32.gmra.mxu0 %vm67_vm0, %v51_v22  ;;  %519 = vmatmul.msk.f32.gmra.mxu2 %vm67_vm0, %v59_v23  ;;  %v764_v22 = vld [vmem:[%s862_s4] ss:$0 sm:$0xff] }
  0x3d   :  { %512 = vmatmul.msk.f32.gmra.mxu0 %vm67_vm0, %v52_v25  ;;  %520 = vmatmul.msk.f32.gmra.mxu2 %vm67_vm0, %v60_v26  ;;  %v770_v25 = vld [vmem:[%s863_s5] ss:$0 sm:$0xff] }
  0x45   :  { %513 = vmatmul.msk.f32.gmra.mxu0 %vm67_vm0, %v53_v27  ;;  %521 = vmatmul.msk.f32.gmra.mxu2 %vm67_vm0, %v61_v28 }
  0x4d   :  { %514 = vmatmul.msk.f32.gmra.mxu0 %vm67_vm0, %v54_v29  ;;  %522 = vmatmul.msk.f32.gmra.mxu2 %vm67_vm0, %v62_v30  ;;  %vm495_vm0 = vcmask 982912  }
  0x92   :  { %v133_v35 = vpop.f32.mrf.mxu0 }
  0x93   :  { %v134_v36 = vadd.f32 %v724_v34, %v133_v35 }
  0x95   :  { %v181_v37 = vmax.f32 %v134_v36, 0.0 }
  0x97   :  { %523 = vmatmul.msk.f32.vlgmr.msra.gmra.mxu1 %vm201_vm1, %v181_v37 }
  0x98   :  { %v157_v38 = vpop.f32.mrf.mxu2 }
  0x99   :  { %v158_v18 = vadd.f32 %v724_v34, %v157_v38 }
  0x9a   :  { %v136_v39 = vpop.f32.mrf.mxu0 }
  0x9b   :  { %v137_v40 = vadd.f32 %v724_v34, %v136_v39  ;;  %v189_v21 = vmax.f32 %v158_v18, 0.0 }
  0x9d   :  { %v182_v41 = vmax.f32 %v137_v40, 0.0 }
  0x9f   :  { %524 = vmatmul.msk.f32.gmra.mxu1 %vm201_vm1, %v182_v41 }
  0xa0   :  { %v160_v42 = vpop.f32.mrf.mxu2 }
  0xa1   :  { %v161_v43 = vadd.f32 %v724_v34, %v160_v42 }
  0xa2   :  { %v139_v44 = vpop.f32.mrf.mxu0 }
  0xa3   :  { %v190_v45 = vmax.f32 %v161_v43, 0.0  ;;  %v140_v46 = vadd.f32 %v724_v34, %v139_v44 }
  0xa5   :  { %v183_v47 = vmax.f32 %v140_v46, 0.0  ;;  %532 = vmatmul.msk.f32.vlgmr.msra.gmra.mxu3 %vm201_vm1, %v190_v45 }
  0xa7   :  { %525 = vmatmul.msk.f32.gmra.mxu1 %vm201_vm1, %v183_v47 }
  0xa8   :  { %v163_v48 = vpop.f32.mrf.mxu2 }
  0xa9   :  { %v164_v49 = vadd.f32 %v724_v34, %v163_v48 }
  0xaa   :  { %v142_v50 = vpop.f32.mrf.mxu0 }
  0xab   :  { %v191_v51 = vmax.f32 %v164_v49, 0.0  ;;  %v143_v52 = vadd.f32 %v724_v34, %v142_v50 }
  0xad   :  { %v184_v53 = vmax.f32 %v143_v52, 0.0  ;;  %533 = vmatmul.msk.f32.gmra.mxu3 %vm201_vm1, %v191_v51 }
  0xaf   :  { %526 = vmatmul.msk.f32.gmra.mxu1 %vm201_vm1, %v184_v53 }
  0xb0   :  { %v166_v54 = vpop.f32.mrf.mxu2 }
  0xb1   :  { %v167_v55 = vadd.f32 %v724_v34, %v166_v54 }
  0xb2   :  { %v145_v56 = vpop.f32.mrf.mxu0 }
  0xb3   :  { %v192_v57 = vmax.f32 %v167_v55, 0.0  ;;  %v146_v58 = vadd.f32 %v724_v34, %v145_v56 }
  0xb5   :  { %v185_v59 = vmax.f32 %v146_v58, 0.0  ;;  %534 = vmatmul.msk.f32.gmra.mxu3 %vm201_vm1, %v192_v57 }
  0xb7   :  { %527 = vmatmul.msk.f32.gmra.mxu1 %vm201_vm1, %v185_v59 }
  0xb8   :  { %v169_v61 = vpop.f32.mrf.mxu2 }
  0xb9   :  { %v170_v63 = vadd.f32 %v724_v34, %v169_v61 }
  0xba   :  { %v148_v0 = vpop.f32.mrf.mxu0 }
  0xbb   :  { %v193_v1 = vmax.f32 %v170_v63, 0.0  ;;  %v149_v2 = vadd.f32 %v724_v34, %v148_v0 }
  0xbd   :  { %v186_v3 = vmax.f32 %v149_v2, 0.0  ;;  %535 = vmatmul.msk.f32.gmra.mxu3 %vm201_vm1, %v193_v1 }
  0xbf   :  { %528 = vmatmul.msk.f32.gmra.mxu1 %vm201_vm1, %v186_v3 }
  0xc0   :  { %v172_v5 = vpop.f32.mrf.mxu2 }
  0xc1   :  { %v173_v6 = vadd.f32 %v724_v34, %v172_v5 }
  0xc2   :  { %v151_v7 = vpop.f32.mrf.mxu0 }
  0xc3   :  { %v194_v8 = vmax.f32 %v173_v6, 0.0  ;;  %v152_v9 = vadd.f32 %v724_v34, %v151_v7 }
  0xc5   :  { %v187_v10 = vmax.f32 %v152_v9, 0.0  ;;  %536 = vmatmul.msk.f32.gmra.mxu3 %vm201_vm1, %v194_v8 }
  0xc7   :  { %529 = vmatmul.msk.f32.gmra.mxu1 %vm201_vm1, %v187_v10 }
  0xc8   :  { %v175_v11 = vpop.f32.mrf.mxu2 }
  0xc9   :  { %v176_v12 = vadd.f32 %v724_v34, %v175_v11 }
  0xca   :  { %v154_v13 = vpop.f32.mrf.mxu0 }
  0xcb   :  { %v195_v14 = vmax.f32 %v176_v12, 0.0  ;;  %v155_v15 = vadd.f32 %v724_v34, %v154_v13 }
  0xcd   :  { %v188_v16 = vmax.f32 %v155_v15, 0.0  ;;  %537 = vmatmul.msk.f32.gmra.mxu3 %vm201_vm1, %v195_v14 }
  0xcf   :  { %530 = vmatmul.msk.f32.gmra.mxu1 %vm201_vm1, %v188_v16 }
  0xd0   :  { %v178_v17 = vpop.f32.mrf.mxu2 }
  0xd1   :  { %v179_v19 = vadd.f32 %v724_v34, %v178_v17 }
  0xd3   :  { %v196_v20 = vmax.f32 %v179_v19, 0.0 }
  0xd5   :  { %538 = vmatmul.msk.f32.gmra.mxu3 %vm201_vm1, %v196_v20 }
  0xd7   :  { %531 = vmatmul.msk.f32.gmra.mxu1 %vm201_vm1, %v189_v21  ;;  %vm499_vm1 = vcmask 1048512  }
 0x114   :  { %v267_v23 = vpop.f32.mrf.mxu1 }
 0x115   :  { %v268_v24 = vadd.f32 %v764_v22, %v267_v23 }
 0x117   :  { %v315_v26 = vmax.f32 %v268_v24, 0.0 }
 0x119   :  { %v334_v27 = vmul.f32 %v770_v25, %v315_v26 }
 0x11b   :  { %v351_v28 = vsel %vm350_vm2, %v334_v27, 0.0 }
 0x11c   :  { %v270_v29 = vpop.f32.mrf.mxu1  ;;  %352 = vadd.xlane.f32.xlu0 %v351_v28 }
 0x11d   :  { %v271_v30 = vadd.f32 %v764_v22, %v270_v29 }
 0x11f   :  { %v316_v31 = vmax.f32 %v271_v30, 0.0 }
 0x121   :  { %v335_v32 = vmul.f32 %v770_v25, %v316_v31 }
 0x123   :  { %v354_v33 = vsel %vm350_vm2, %v335_v32, 0.0 }
 0x124   :  { %v273_v34 = vpop.f32.mrf.mxu1  ;;  %355 = vadd.xlane.f32.xlu1 %v354_v33 }
 0x125   :  { %v274_v35 = vadd.f32 %v764_v22, %v273_v34 }
 0x127   :  { %v317_v36 = vmax.f32 %v274_v35, 0.0 }
 0x128   :  { %v294_v37 = vpop.f32.mrf.mxu3 }
 0x129   :  { %v295_v38 = vadd.f32 %v764_v22, %v294_v37  ;;  %v336_v39 = vmul.f32 %v770_v25, %v317_v36 }
 0x12b   :  { %v324_v40 = vmax.f32 %v295_v38, 0.0  ;;  %v357_v41 = vsel %vm350_vm2, %v336_v39, 0.0 }
 0x12c   :  { %v276_v42 = vpop.f32.mrf.mxu1  ;;  %358 = vadd.xlane.f32.xlu1 %v357_v41 }
 0x12d   :  { %v277_v43 = vadd.f32 %v764_v22, %v276_v42  ;;  %v343_v44 = vmul.f32 %v770_v25, %v324_v40 }
 0x12f   :  { %v318_v45 = vmax.f32 %v277_v43, 0.0  ;;  %v378_v49 = vsel %vm350_vm2, %v343_v44, 0.0 }
 0x130   :  { %v297_v46 = vpop.f32.mrf.mxu3 }
 0x131   :  { %v298_v47 = vadd.f32 %v764_v22, %v297_v46  ;;  %v337_v48 = vmul.f32 %v770_v25, %v318_v45 }
 0x133   :  { %v325_v50 = vmax.f32 %v298_v47, 0.0  ;;  %v360_v51 = vsel %vm350_vm2, %v337_v48, 0.0  ;;  %v403_v48 = vpop.permute.xlu0 %402 }
 0x134   :  { %v279_v52 = vpop.f32.mrf.mxu1  ;;  %361 = vadd.xlane.f32.xlu2 %v360_v51  ;;  %379 = vadd.xlane.f32.xlu1 %v378_v49  ;;  %v438_v49 = vlaneseq }
 0x135   :  { %v344_v53 = vmul.f32 %v770_v25, %v325_v50  ;;  %v280_v54 = vadd.f32 %v764_v22, %v279_v52  ;;  %v819_v52 = vperm.slane %v403_v48, 0 }
 0x137   :  { %v381_v57 = vsel %vm350_vm2, %v344_v53, 0.0  ;;  %v319_v58 = vmax.f32 %v280_v54, 0.0  ;;  %v821_v53 = vand.u32 127, %v438_v49 }
 0x138   :  { %v300_v55 = vpop.f32.mrf.mxu3 }
 0x139   :  { %v301_v56 = vadd.f32 %v764_v22, %v300_v55  ;;  %v338_v1 = vmul.f32 %v770_v25, %v319_v58  ;;  %v441_v54 = vadd.s32 4294967288, %v821_v53  ;;  %v497_v48 = vadd.s32 4294967176, %v821_v53 }
 0x13b   :  { %v326_v59 = vmax.f32 %v301_v56, 0.0  ;;  %v363_v5 = vsel %vm350_vm2, %v338_v1, 0.0  ;;  %v445_v56 = vadd.s32 4294967280, %v821_v53 }
 0x13c   :  { %v282_v60 = vpop.f32.mrf.mxu1  ;;  %382 = vadd.xlane.f32.xlu2 %v381_v57 }
 0x13d   :  { %v283_v61 = vadd.f32 %v764_v22, %v282_v60  ;;  %v345_v62 = vmul.f32 %v770_v25, %v326_v59  ;;  %v449_v59 = vadd.s32 4294967272, %v821_v53 }
 0x13f   :  { %v320_v63 = vmax.f32 %v283_v61, 0.0  ;;  %v384_v0 = vsel %vm350_vm2, %v345_v62, 0.0  ;;  %v453_v61 = vadd.s32 4294967264, %v821_v53 }
 0x140   :  { %v303_v2 = vpop.f32.mrf.mxu3  ;;  %385 = vadd.xlane.f32.xlu1 %v384_v0  ;;  %v457_v0 = vadd.s32 4294967256, %v821_v53 }
 0x141   :  { %v304_v3 = vadd.f32 %v764_v22, %v303_v2  ;;  %v339_v6 = vmul.f32 %v770_v25, %v320_v63 }
 0x143   :  { %v327_v4 = vmax.f32 %v304_v3, 0.0  ;;  %v366_v10 = vsel %vm350_vm2, %v339_v6, 0.0 }
 0x144   :  { %v285_v7 = vpop.f32.mrf.mxu1  ;;  %364 = vadd.xlane.f32.xlu2 %v363_v5 }
 0x145   :  { %v346_v8 = vmul.f32 %v770_v25, %v327_v4  ;;  %v286_v9 = vadd.f32 %v764_v22, %v285_v7  ;;  %v461_v4 = vadd.s32 4294967248, %v821_v53 }
 0x147   :  { %v387_v12 = vsel %vm350_vm2, %v346_v8, 0.0  ;;  %v321_v13 = vmax.f32 %v286_v9, 0.0 }
 0x148   :  { %v306_v11 = vpop.f32.mrf.mxu3  ;;  %367 = vadd.xlane.f32.xlu1 %v366_v10 }
 0x149   :  { %v307_v16 = vadd.f32 %v764_v22, %v306_v11  ;;  %v340_v18 = vmul.f32 %v770_v25, %v321_v13 }
 0x14b   :  { %v328_v21 = vmax.f32 %v307_v16, 0.0  ;;  %v369_v23 = vsel %vm350_vm2, %v340_v18, 0.0 }
 0x14c   :  { %v288_v14 = vpop.f32.mrf.mxu1  ;;  %388 = vadd.xlane.f32.xlu2 %v387_v12  ;;  %v465_v12 = vadd.s32 4294967240, %v821_v53 }
 0x14d   :  { %v289_v15 = vadd.f32 %v764_v22, %v288_v14  ;;  %v347_v30 = vmul.f32 %v770_v25, %v328_v21  ;;  %v477_v21 = vadd.s32 4294967216, %v821_v53 }
 0x14f   :  { %v322_v17 = vmax.f32 %v289_v15, 0.0  ;;  %v390_v37 = vsel %vm350_vm2, %v347_v30, 0.0  ;;  %v481_v30 = vadd.s32 4294967208, %v821_v53 }
 0x150   :  { %v309_v19 = vpop.f32.mrf.mxu3 }
 0x151   :  { %v341_v20 = vmul.f32 %v770_v25, %v322_v17  ;;  %v310_v28 = vadd.f32 %v764_v22, %v309_v19  ;;  %v473_v17 = vadd.s32 4294967224, %v821_v53  ;;  %v469_v19 = vadd.s32 4294967232, %v821_v53 }
 0x153   :  { %v372_v24 = vsel %vm350_vm2, %v341_v20, 0.0  ;;  %v329_v34 = vmax.f32 %v310_v28, 0.0 }
 0x154   :  { %v291_v26 = vpop.f32.mrf.mxu1  ;;  %370 = vadd.xlane.f32.xlu2 %v369_v23  ;;  %373 = vadd.xlane.f32.xlu1 %v372_v24 }
 0x155   :  { %v292_v27 = vadd.f32 %v764_v22, %v291_v26  ;;  %v348_v40 = vmul.f32 %v770_v25, %v329_v34 }
 0x157   :  { %v323_v29 = vmax.f32 %v292_v27, 0.0  ;;  %v393_v41 = vsel %vm350_vm2, %v348_v40, 0.0  ;;  %v489_v40 = vadd.s32 4294967192, %v821_v53 }
 0x158   :  { %v312_v31 = vpop.f32.mrf.mxu3 }
 0x159   :  { %v313_v32 = vadd.f32 %v764_v22, %v312_v31  ;;  %v342_v33 = vmul.f32 %v770_v25, %v323_v29 }
 0x15b   :  { %v330_v35 = vmax.f32 %v313_v32, 0.0  ;;  %v375_v36 = vsel %vm350_vm2, %v342_v33, 0.0  ;;  %v485_v32 = vadd.s32 4294967200, %v821_v53 }
 0x15c   :  { %376 = vadd.xlane.f32.xlu2 %v375_v36  ;;  %391 = vadd.xlane.f32.xlu1 %v390_v37 }
 0x15d   :  { %v349_v38 = vmul.f32 %v770_v25, %v330_v35 }
 0x15f   :  { %v396_v39 = vsel %vm350_vm2, %v349_v38, 0.0 }
 0x160   :  { %397 = vadd.xlane.f32.xlu0 %v396_v39 }
 0x164   :  { %394 = vadd.xlane.f32.xlu2 %v393_v41 }
 0x18f   :  { %v353_v25 = vpop.xlane.xlu0 %352 }
 0x190   :  { %v406_v58 = vadd.f32 %v819_v52, %v353_v25 }
 0x192   :  { %v440_v7 = vperm.slane %v406_v58, %v821_v53 }
 0x197   :  { %v356_v22 = vpop.xlane.xlu1 %355 }
 0x198   :  { %v407_v55 = vadd.f32 %v819_v52, %v356_v22 }
 0x19a   :  { %v442_v63 = vperm.slane %v407_v55, %v441_v54 }
 0x19c   :  { %v444_v10 = vsel %vm443_vm3, %v442_v63, %v440_v7 }
 0x19f   :  { %v359_v42 = vpop.xlane.xlu1 %358 }
 0x1a0   :  { %v408_v57 = vadd.f32 %v819_v52, %v359_v42 }
 0x1a2   :  { %v446_v3 = vperm.slane %v408_v57, %v445_v56 }
 0x1a4   :  { %v448_v14 = vsel %vm447_vm4, %v446_v3, %v444_v10 }
 0x1a7   :  { %v362_v43 = vpop.xlane.xlu2 %361  ;;  %v380_v44 = vpop.xlane.xlu1 %379 }
 0x1a8   :  { %v409_v60 = vadd.f32 %v819_v52, %v362_v43  ;;  %v415_v20 = vadd.f32 %v819_v52, %v380_v44 }
 0x1aa   :  { %v450_v8 = vperm.slane %v409_v60, %v449_v59  ;;  %v474_v36 = vperm.slane %v415_v20, %v473_v17 }
 0x1ac   :  { %v452_v16 = vsel %vm451_vm5, %v450_v8, %v448_v14 }
 0x1af   :  { %v383_v45 = vpop.xlane.xlu2 %382 }
 0x1b0   :  { %v416_v27 = vadd.f32 %v819_v52, %v383_v45 }
 0x1b2   :  { %v478_v38 = vperm.slane %v416_v27, %v477_v21 }
 0x1b3   :  { %v386_v46 = vpop.xlane.xlu1 %385 }
 0x1b4   :  { %v417_v31 = vadd.f32 %v819_v52, %v386_v46  ;;  %v493_v46 = vadd.s32 4294967184, %v821_v53 }
 0x1b6   :  { %v482_v22 = vperm.slane %v417_v31, %v481_v30 }
 0x1b7   :  { %v365_v47 = vpop.xlane.xlu2 %364 }
 0x1b8   :  { %v410_v62 = vadd.f32 %v819_v52, %v365_v47 }
 0x1ba   :  { %v454_v9 = vperm.slane %v410_v62, %v453_v61 }
 0x1bb   :  { %v368_v51 = vpop.xlane.xlu1 %367 }
 0x1bc   :  { %v411_v1 = vadd.f32 %v819_v52, %v368_v51  ;;  %v456_v18 = vsel %vm455_vm6, %v454_v9, %v452_v16 }
 0x1be   :  { %v458_v11 = vperm.slane %v411_v1, %v457_v0 }
 0x1bf   :  { %v389_v50 = vpop.xlane.xlu2 %388 }
 0x1c0   :  { %v460_v23 = vsel %vm459_vm7, %v458_v11, %v456_v18  ;;  %v418_v33 = vadd.f32 %v819_v52, %v389_v50 }
 0x1c2   :  { %v486_v44 = vperm.slane %v418_v33, %v485_v32 }
 0x1c7   :  { %v371_v2 = vpop.xlane.xlu2 %370  ;;  %v374_v6 = vpop.xlane.xlu1 %373 }
 0x1c8   :  { %v412_v5 = vadd.f32 %v819_v52, %v371_v2  ;;  %v413_v13 = vadd.f32 %v819_v52, %v374_v6 }
 0x1ca   :  { %v462_v15 = vperm.slane %v412_v5, %v461_v4  ;;  %v466_v24 = vperm.slane %v413_v13, %v465_v12 }
 0x1cc   :  { %v464_v28 = vsel %vm463_vm8, %v462_v15, %v460_v23 }
 0x1cd   :  { %v468_v37 = vsel %vm467_vm9, %v466_v24, %v464_v28 }
 0x1cf   :  { %v377_v26 = vpop.xlane.xlu2 %376  ;;  %v392_v35 = vpop.xlane.xlu1 %391 }
 0x1d0   :  { %v414_v29 = vadd.f32 %v819_v52, %v377_v26  ;;  %v419_v43 = vadd.f32 %v819_v52, %v392_v35 }
 0x1d2   :  { %v470_v34 = vperm.slane %v414_v29, %v469_v19  ;;  %v490_v54 = vperm.slane %v419_v43, %v489_v40 }
 0x1d3   :  { %v398_v41 = vpop.xlane.xlu0 %397 }
 0x1d4   :  { %v472_v39 = vsel %vm471_vm10, %v470_v34, %v468_v37  ;;  %v421_v49 = vadd.f32 %v819_v52, %v398_v41 }
 0x1d5   :  { %v476_v42 = vsel %vm475_vm11, %v474_v36, %v472_v39 }
 0x1d6   :  { %v480_v45 = vsel %vm479_vm12, %v478_v38, %v476_v42  ;;  %v498_v57 = vperm.slane %v421_v49, %v497_v48 }
 0x1d7   :  { %v484_v47 = vsel %vm483_vm13, %v482_v22, %v480_v45  ;;  %v395_v50 = vpop.xlane.xlu2 %394 }
 0x1d8   :  { %v488_v51 = vsel %vm487_vm14, %v486_v44, %v484_v47  ;;  %v420_v25 = vadd.f32 %v819_v52, %v395_v50 }
 0x1d9   :  { %v492_v56 = vsel %vm491_vm15, %v490_v54, %v488_v51 }
 0x1da   :  { %v494_v55 = vperm.slane %v420_v25, %v493_v46 }
 0x1dc   :  { %v496_v58 = vsel %vm495_vm0, %v494_v55, %v492_v56 }
 0x1dd   :  { %v500_v59 = vsel %vm499_vm1, %v498_v57, %v496_v58 }
 0x1de   :  { %502 = vst [vmem:[%s865_s7] sm:$0x1] %v500_v59 }

// kernel: _critic_forward.1
= control target key start
LH: loop header
LB: loop body
LE: loop exit
PB: predicated region body
PF: predicated region fallthrough
CT: control target
= control target key end

     0   :  { %vm67_vm0 = vcmask 654336   ;;  %vm201_vm1 = vcmask 523264   ;;  %vm350_vm2 = vcmask 261120   ;;  %vm419_vm3 = vcmask 7168   ;;  %s796_s1 = inlined_call_operand.vmem [shape: f32[80,64], index: 1, kind: input, shape index: {}]   ;;  %s797_s2 = inlined_call_operand.vmem [shape: f32[1,64], index: 2, kind: input, shape index: {}]   ;;  %s798_s0 = inlined_call_operand.vmem [shape: f32[128,80], index: 0, kind: input, shape index: {}]   ;;  %s799_s3 = inlined_call_operand.vmem [shape: f32[64,32], index: 3, kind: input, shape index: {}]   ;;  %s800_s4 = inlined_call_operand.vmem [shape: f32[1,32], index: 4, kind: input, shape index: {}]   ;;  %s801_s5 = inlined_call_operand.vmem [shape: f32[1,32], index: 5, kind: input, shape index: {}]   ;;  %s802_s6 = inlined_call_operand.<no memory space> [shape: f32[1,1], index: 6, kind: input, shape index: {}]   ;;  %s803_s7 = inlined_call_operand.vmem [shape: f32[128,1], index: 7, kind: output, shape index: {}]  }
   0x1   :  { %v37_v0 = vld [vmem:[%s796_s1 + $0x48] sm:$0xff]  ;;  %v36_v1 = vld [vmem:[%s796_s1 + $0x40] sm:$0xff]  ;;  %v35_v2 = vld [vmem:[%s796_s1 + $0x38] sm:$0xff] }
   0x2   :  { %122 = vmatpush.msra.mxu0 %v37_v0  ;;  %472 = vmatpush.msra.mxu2 %v37_v0  ;;  %v34_v3 = vld [vmem:[%s796_s1 + $0x30] sm:$0xff]  ;;  %v33_v4 = vld [vmem:[%s796_s1 + $0x28] sm:$0xff]  ;;  %v32_v5 = vld [vmem:[%s796_s1 + $0x20] sm:$0xff] }
   0x3   :  { %v31_v6 = vld [vmem:[%s796_s1 + $0x18] sm:$0xff]  ;;  %v30_v7 = vld [vmem:[%s796_s1 + $0x10] sm:$0xff]  ;;  %v29_v8 = vld [vmem:[%s796_s1 + $0x8] sm:$0xff] }
   0x4   :  { %123 = vmatpush.msra.mxu0 %v36_v1  ;;  %473 = vmatpush.msra.mxu2 %v36_v1  ;;  %v28_v9 = vld [vmem:[%s796_s1] sm:$0xff]  ;;  %v48_v12 = vld [vmem:[%s798_s0 + $0x8] sm:$0xff]  ;;  %v49_v14 = vld [vmem:[%s798_s0 + $0x10] sm:$0xff] }
   0x5   :  { %v47_v10 = vld [vmem:[%s798_s0] sm:$0xff]  ;;  %v56_v13 = vld [vmem:[%s798_s0 + $0x48] sm:$0xff]  ;;  %v57_v15 = vld [vmem:[%s798_s0 + $0x50] sm:$0xff] }
   0x6   :  { %124 = vmatpush.msra.mxu0 %v35_v2  ;;  %474 = vmatpush.msra.mxu2 %v35_v2  ;;  %v55_v11 = vld [vmem:[%s798_s0 + $0x40] sm:$0xff]  ;;  %v50_v16 = vld [vmem:[%s798_s0 + $0x18] sm:$0xff]  ;;  %v44_v19 = vld [vmem:[%s799_s3 + $0x30] sm:$0xff] }
   0x7   :  { %v58_v17 = vld [vmem:[%s798_s0 + $0x58] sm:$0xff]  ;;  %v43_v20 = vld [vmem:[%s799_s3 + $0x28] sm:$0xff]  ;;  %v42_v21 = vld [vmem:[%s799_s3 + $0x20] sm:$0xff] }
   0x8   :  { %125 = vmatpush.msra.mxu0 %v34_v3  ;;  %475 = vmatpush.msra.mxu2 %v34_v3  ;;  %v45_v18 = vld [vmem:[%s799_s3 + $0x38] sm:$0xff]  ;;  %v51_v22 = vld [vmem:[%s798_s0 + $0x20] sm:$0xff]  ;;  %v52_v25 = vld [vmem:[%s798_s0 + $0x28] sm:$0xff] }
   0x9   :  { %258 = vmatpush.msra.mxu1 %v45_v18  ;;  %482 = vmatpush.msra.mxu3 %v45_v18  ;;  %v59_v23 = vld [vmem:[%s798_s0 + $0x60] sm:$0xff]  ;;  %v41_v24 = vld [vmem:[%s799_s3 + $0x18] sm:$0xff]  ;;  %v60_v26 = vld [vmem:[%s798_s0 + $0x68] sm:$0xff] }
   0xa   :  { %126 = vmatpush.msra.mxu0 %v33_v4  ;;  %476 = vmatpush.msra.mxu2 %v33_v4  ;;  %v53_v27 = vld [vmem:[%s798_s0 + $0x30] sm:$0xff]  ;;  %v54_v29 = vld [vmem:[%s798_s0 + $0x38] sm:$0xff]  ;;  %v39_v32 = vld [vmem:[%s799_s3 + $0x8] sm:$0xff] }
   0xb   :  { %259 = vmatpush.msra.mxu1 %v44_v19  ;;  %483 = vmatpush.msra.mxu3 %v44_v19  ;;  %v61_v28 = vld [vmem:[%s798_s0 + $0x70] sm:$0xff]  ;;  %v62_v30 = vld [vmem:[%s798_s0 + $0x78] sm:$0xff]  ;;  %v38_v33 = vld [vmem:[%s799_s3] sm:$0xff] }
   0xc   :  { %127 = vmatpush.msra.mxu0 %v32_v5  ;;  %477 = vmatpush.msra.mxu2 %v32_v5  ;;  %v40_v31 = vld [vmem:[%s799_s3 + $0x10] sm:$0xff]  ;;  %v490_v34 = vld [vmem:[%s797_s2] ss:$0 sm:$0xff] }
   0xd   :  { %260 = vmatpush.msra.mxu1 %v43_v20  ;;  %484 = vmatpush.msra.mxu3 %v43_v20  ;;  %v674_v19 = vld [vmem:[%s800_s4] ss:$0 sm:$0xff] }
   0xe   :  { %128 = vmatpush.msra.mxu0 %v31_v6  ;;  %478 = vmatpush.msra.mxu2 %v31_v6 }
   0xf   :  { %261 = vmatpush.msra.mxu1 %v42_v21  ;;  %485 = vmatpush.msra.mxu3 %v42_v21 }
  0x10   :  { %129 = vmatpush.msra.mxu0 %v30_v7  ;;  %479 = vmatpush.msra.mxu2 %v30_v7 }
  0x11   :  { %262 = vmatpush.msra.mxu1 %v41_v24  ;;  %486 = vmatpush.msra.mxu3 %v41_v24 }
  0x12   :  { %130 = vmatpush.msra.mxu0 %v29_v8  ;;  %480 = vmatpush.msra.mxu2 %v29_v8 }
  0x13   :  { %263 = vmatpush.msra.mxu1 %v40_v31  ;;  %487 = vmatpush.msra.mxu3 %v40_v31 }
  0x14   :  { %131 = vmatpush.msra.mxu0 %v28_v9  ;;  %481 = vmatpush.msra.mxu2 %v28_v9 }
  0x15   :  { %440 = vmatmul.msk.f32.vlgmr.msra.gmra.mxu0 %vm67_vm0, %v47_v10  ;;  %448 = vmatmul.msk.f32.vlgmr.msra.gmra.mxu2 %vm67_vm0, %v55_v11 }
  0x16   :  { %264 = vmatpush.msra.mxu1 %v39_v32  ;;  %488 = vmatpush.msra.mxu3 %v39_v32 }
  0x18   :  { %265 = vmatpush.msra.mxu1 %v38_v33  ;;  %489 = vmatpush.msra.mxu3 %v38_v33 }
  0x1d   :  { %441 = vmatmul.msk.f32.gmra.mxu0 %vm67_vm0, %v48_v12  ;;  %449 = vmatmul.msk.f32.gmra.mxu2 %vm67_vm0, %v56_v13 }
  0x25   :  { %442 = vmatmul.msk.f32.gmra.mxu0 %vm67_vm0, %v49_v14  ;;  %450 = vmatmul.msk.f32.gmra.mxu2 %vm67_vm0, %v57_v15 }
  0x2d   :  { %443 = vmatmul.msk.f32.gmra.mxu0 %vm67_vm0, %v50_v16  ;;  %451 = vmatmul.msk.f32.gmra.mxu2 %vm67_vm0, %v58_v17 }
  0x35   :  { %444 = vmatmul.msk.f32.gmra.mxu0 %vm67_vm0, %v51_v22  ;;  %452 = vmatmul.msk.f32.gmra.mxu2 %vm67_vm0, %v59_v23  ;;  %v680_v22 = vld [vmem:[%s801_s5] ss:$0 sm:$0xff] }
  0x3d   :  { %445 = vmatmul.msk.f32.gmra.mxu0 %vm67_vm0, %v52_v25  ;;  %453 = vmatmul.msk.f32.gmra.mxu2 %vm67_vm0, %v60_v26 }
  0x45   :  { %446 = vmatmul.msk.f32.gmra.mxu0 %vm67_vm0, %v53_v27  ;;  %454 = vmatmul.msk.f32.gmra.mxu2 %vm67_vm0, %v61_v28 }
  0x4d   :  { %447 = vmatmul.msk.f32.gmra.mxu0 %vm67_vm0, %v54_v29  ;;  %455 = vmatmul.msk.f32.gmra.mxu2 %vm67_vm0, %v62_v30 }
  0x92   :  { %v133_v35 = vpop.f32.mrf.mxu0 }
  0x93   :  { %v134_v36 = vadd.f32 %v490_v34, %v133_v35 }
  0x95   :  { %v181_v37 = vmax.f32 %v134_v36, 0.0 }
  0x97   :  { %456 = vmatmul.msk.f32.vlgmr.msra.gmra.mxu1 %vm201_vm1, %v181_v37 }
  0x98   :  { %v157_v38 = vpop.f32.mrf.mxu2 }
  0x99   :  { %v158_v15 = vadd.f32 %v490_v34, %v157_v38 }
  0x9a   :  { %v136_v39 = vpop.f32.mrf.mxu0 }
  0x9b   :  { %v137_v40 = vadd.f32 %v490_v34, %v136_v39  ;;  %v189_v18 = vmax.f32 %v158_v15, 0.0 }
  0x9d   :  { %v182_v41 = vmax.f32 %v137_v40, 0.0 }
  0x9f   :  { %457 = vmatmul.msk.f32.gmra.mxu1 %vm201_vm1, %v182_v41 }
  0xa0   :  { %v160_v42 = vpop.f32.mrf.mxu2 }
  0xa1   :  { %v161_v43 = vadd.f32 %v490_v34, %v160_v42 }
  0xa2   :  { %v139_v44 = vpop.f32.mrf.mxu0 }
  0xa3   :  { %v190_v45 = vmax.f32 %v161_v43, 0.0  ;;  %v140_v46 = vadd.f32 %v490_v34, %v139_v44 }
  0xa5   :  { %v183_v47 = vmax.f32 %v140_v46, 0.0  ;;  %465 = vmatmul.msk.f32.vlgmr.msra.gmra.mxu3 %vm201_vm1, %v190_v45 }
  0xa7   :  { %458 = vmatmul.msk.f32.gmra.mxu1 %vm201_vm1, %v183_v47 }
  0xa8   :  { %v163_v48 = vpop.f32.mrf.mxu2 }
  0xa9   :  { %v164_v49 = vadd.f32 %v490_v34, %v163_v48 }
  0xaa   :  { %v142_v50 = vpop.f32.mrf.mxu0 }
  0xab   :  { %v191_v51 = vmax.f32 %v164_v49, 0.0  ;;  %v143_v52 = vadd.f32 %v490_v34, %v142_v50 }
  0xad   :  { %v184_v53 = vmax.f32 %v143_v52, 0.0  ;;  %466 = vmatmul.msk.f32.gmra.mxu3 %vm201_vm1, %v191_v51 }
  0xaf   :  { %459 = vmatmul.msk.f32.gmra.mxu1 %vm201_vm1, %v184_v53 }
  0xb0   :  { %v166_v54 = vpop.f32.mrf.mxu2 }
  0xb1   :  { %v167_v55 = vadd.f32 %v490_v34, %v166_v54 }
  0xb2   :  { %v145_v56 = vpop.f32.mrf.mxu0 }
  0xb3   :  { %v192_v57 = vmax.f32 %v167_v55, 0.0  ;;  %v146_v58 = vadd.f32 %v490_v34, %v145_v56 }
  0xb5   :  { %v185_v59 = vmax.f32 %v146_v58, 0.0  ;;  %467 = vmatmul.msk.f32.gmra.mxu3 %vm201_vm1, %v192_v57 }
  0xb7   :  { %460 = vmatmul.msk.f32.gmra.mxu1 %vm201_vm1, %v185_v59 }
  0xb8   :  { %v169_v60 = vpop.f32.mrf.mxu2 }
  0xb9   :  { %v170_v61 = vadd.f32 %v490_v34, %v169_v60 }
  0xba   :  { %v148_v62 = vpop.f32.mrf.mxu0 }
  0xbb   :  { %v193_v63 = vmax.f32 %v170_v61, 0.0  ;;  %v149_v0 = vadd.f32 %v490_v34, %v148_v62 }
  0xbd   :  { %v186_v1 = vmax.f32 %v149_v0, 0.0  ;;  %468 = vmatmul.msk.f32.gmra.mxu3 %vm201_vm1, %v193_v63 }
  0xbf   :  { %461 = vmatmul.msk.f32.gmra.mxu1 %vm201_vm1, %v186_v1 }
  0xc0   :  { %v172_v2 = vpop.f32.mrf.mxu2 }
  0xc1   :  { %v173_v3 = vadd.f32 %v490_v34, %v172_v2 }
  0xc2   :  { %v151_v4 = vpop.f32.mrf.mxu0 }
  0xc3   :  { %v152_v5 = vadd.f32 %v490_v34, %v151_v4  ;;  %v194_v6 = vmax.f32 %v173_v3, 0.0  ;;  %v12_v4 = vstv %s802_s6 }
  0xc4   :  { %13 = vst [vmem:[#allocation2] sm:$0x1] %v12_v4 }
  0xc5   :  { %v187_v7 = vmax.f32 %v152_v5, 0.0  ;;  %469 = vmatmul.msk.f32.gmra.mxu3 %vm201_vm1, %v194_v6 }
  0xc7   :  { %462 = vmatmul.msk.f32.gmra.mxu1 %vm201_vm1, %v187_v7 }
  0xc8   :  { %v175_v8 = vpop.f32.mrf.mxu2 }
  0xc9   :  { %v176_v9 = vadd.f32 %v490_v34, %v175_v8 }
  0xca   :  { %v154_v10 = vpop.f32.mrf.mxu0 }
  0xcb   :  { %v155_v11 = vadd.f32 %v490_v34, %v154_v10  ;;  %v195_v12 = vmax.f32 %v176_v9, 0.0 }
  0xcd   :  { %v188_v13 = vmax.f32 %v155_v11, 0.0  ;;  %470 = vmatmul.msk.f32.gmra.mxu3 %vm201_vm1, %v195_v12 }
  0xcf   :  { %463 = vmatmul.msk.f32.gmra.mxu1 %vm201_vm1, %v188_v13 }
  0xd0   :  { %v178_v14 = vpop.f32.mrf.mxu2 }
  0xd1   :  { %v179_v16 = vadd.f32 %v490_v34, %v178_v14 }
  0xd3   :  { %v196_v17 = vmax.f32 %v179_v16, 0.0 }
  0xd5   :  { %471 = vmatmul.msk.f32.gmra.mxu3 %vm201_vm1, %v196_v17 }
  0xd7   :  { %464 = vmatmul.msk.f32.gmra.mxu1 %vm201_vm1, %v189_v18 }
 0x114   :  { %v267_v20 = vpop.f32.mrf.mxu1 }
 0x115   :  { %v268_v21 = vadd.f32 %v674_v19, %v267_v20 }
 0x117   :  { %v315_v23 = vmax.f32 %v268_v21, 0.0 }
 0x119   :  { %v334_v24 = vmul.f32 %v680_v22, %v315_v23 }
 0x11b   :  { %v351_v25 = vsel %vm350_vm2, %v334_v24, 0.0 }
 0x11c   :  { %v270_v26 = vpop.f32.mrf.mxu1  ;;  %352 = vadd.xlane.f32.xlu0 %v351_v25 }
 0x11d   :  { %v271_v27 = vadd.f32 %v674_v19, %v270_v26 }
 0x11f   :  { %v316_v28 = vmax.f32 %v271_v27, 0.0 }
 0x121   :  { %v335_v29 = vmul.f32 %v680_v22, %v316_v28 }
 0x123   :  { %v354_v30 = vsel %vm350_vm2, %v335_v29, 0.0 }
 0x124   :  { %v273_v31 = vpop.f32.mrf.mxu1  ;;  %355 = vadd.xlane.f32.xlu0 %v354_v30 }
 0x125   :  { %v274_v32 = vadd.f32 %v674_v19, %v273_v31 }
 0x127   :  { %v317_v33 = vmax.f32 %v274_v32, 0.0 }
 0x128   :  { %v294_v34 = vpop.f32.mrf.mxu3 }
 0x129   :  { %v295_v35 = vadd.f32 %v674_v19, %v294_v34  ;;  %v336_v36 = vmul.f32 %v680_v22, %v317_v33 }
 0x12b   :  { %v324_v37 = vmax.f32 %v295_v35, 0.0  ;;  %v357_v38 = vsel %vm350_vm2, %v336_v36, 0.0 }
 0x12c   :  { %v276_v39 = vpop.f32.mrf.mxu1  ;;  %358 = vadd.xlane.f32.xlu1 %v357_v38 }
 0x12d   :  { %v277_v40 = vadd.f32 %v674_v19, %v276_v39  ;;  %v343_v41 = vmul.f32 %v680_v22, %v324_v37 }
 0x12f   :  { %v318_v42 = vmax.f32 %v277_v40, 0.0  ;;  %v378_v43 = vsel %vm350_vm2, %v343_v41, 0.0 }
 0x130   :  { %v297_v44 = vpop.f32.mrf.mxu3  ;;  %379 = vadd.xlane.f32.xlu0 %v378_v43 }
 0x131   :  { %v298_v45 = vadd.f32 %v674_v19, %v297_v44  ;;  %v337_v46 = vmul.f32 %v680_v22, %v318_v42 }
 0x133   :  { %v325_v47 = vmax.f32 %v298_v45, 0.0  ;;  %v360_v48 = vsel %vm350_vm2, %v337_v46, 0.0 }
 0x134   :  { %v279_v49 = vpop.f32.mrf.mxu1  ;;  %361 = vadd.xlane.f32.xlu1 %v360_v48 }
 0x135   :  { %v280_v50 = vadd.f32 %v674_v19, %v279_v49  ;;  %v344_v51 = vmul.f32 %v680_v22, %v325_v47 }
 0x137   :  { %v319_v52 = vmax.f32 %v280_v50, 0.0  ;;  %v381_v56 = vsel %vm350_vm2, %v344_v51, 0.0 }
 0x138   :  { %v300_v53 = vpop.f32.mrf.mxu3 }
 0x139   :  { %v301_v54 = vadd.f32 %v674_v19, %v300_v53  ;;  %v338_v55 = vmul.f32 %v680_v22, %v319_v52 }
 0x13b   :  { %v326_v57 = vmax.f32 %v301_v54, 0.0  ;;  %v363_v58 = vsel %vm350_vm2, %v338_v55, 0.0 }
 0x13c   :  { %v282_v59 = vpop.f32.mrf.mxu1  ;;  %364 = vadd.xlane.f32.xlu2 %v363_v58  ;;  %382 = vadd.xlane.f32.xlu1 %v381_v56 }
 0x13d   :  { %v345_v60 = vmul.f32 %v680_v22, %v326_v57  ;;  %v283_v61 = vadd.f32 %v674_v19, %v282_v59 }
 0x13f   :  { %v384_v0 = vsel %vm350_vm2, %v345_v60, 0.0  ;;  %v320_v1 = vmax.f32 %v283_v61, 0.0 }
 0x140   :  { %v303_v62 = vpop.f32.mrf.mxu3 }
 0x141   :  { %v304_v63 = vadd.f32 %v674_v19, %v303_v62  ;;  %v339_v9 = vmul.f32 %v680_v22, %v320_v1 }
 0x143   :  { %v327_v2 = vmax.f32 %v304_v63, 0.0  ;;  %v366_v11 = vsel %vm350_vm2, %v339_v9, 0.0 }
 0x144   :  { %v285_v3 = vpop.f32.mrf.mxu1  ;;  %385 = vadd.xlane.f32.xlu2 %v384_v0 }
 0x145   :  { %v286_v5 = vadd.f32 %v674_v19, %v285_v3  ;;  %v346_v6 = vmul.f32 %v680_v22, %v327_v2 }
 0x147   :  { %v321_v7 = vmax.f32 %v286_v5, 0.0  ;;  %v387_v8 = vsel %vm350_vm2, %v346_v6, 0.0 }
 0x148   :  { %388 = vadd.xlane.f32.xlu0 %v387_v8  ;;  %v306_v10 = vpop.f32.mrf.mxu3 }
 0x149   :  { %v340_v12 = vmul.f32 %v680_v22, %v321_v7  ;;  %v307_v16 = vadd.f32 %v674_v19, %v306_v10 }
 0x14b   :  { %v369_v17 = vsel %vm350_vm2, %v340_v12, 0.0  ;;  %v328_v21 = vmax.f32 %v307_v16, 0.0 }
 0x14c   :  { %v288_v13 = vpop.f32.mrf.mxu1  ;;  %367 = vadd.xlane.f32.xlu2 %v366_v11 }
 0x14d   :  { %v289_v14 = vadd.f32 %v674_v19, %v288_v13  ;;  %v347_v28 = vmul.f32 %v680_v22, %v328_v21 }
 0x14f   :  { %v322_v15 = vmax.f32 %v289_v14, 0.0  ;;  %v390_v35 = vsel %vm350_vm2, %v347_v28, 0.0 }
 0x150   :  { %370 = vadd.xlane.f32.xlu0 %v369_v17  ;;  %v309_v18 = vpop.f32.mrf.mxu3 }
 0x151   :  { %v341_v20 = vmul.f32 %v680_v22, %v322_v15  ;;  %v310_v27 = vadd.f32 %v674_v19, %v309_v18 }
 0x153   :  { %v372_v23 = vsel %vm350_vm2, %v341_v20, 0.0  ;;  %v329_v32 = vmax.f32 %v310_v27, 0.0 }
 0x154   :  { %v291_v24 = vpop.f32.mrf.mxu1  ;;  %373 = vadd.xlane.f32.xlu1 %v372_v23 }
 0x155   :  { %v292_v25 = vadd.f32 %v674_v19, %v291_v24  ;;  %v348_v37 = vmul.f32 %v680_v22, %v329_v32 }
 0x157   :  { %v323_v26 = vmax.f32 %v292_v25, 0.0  ;;  %v393_v39 = vsel %vm350_vm2, %v348_v37, 0.0 }
 0x158   :  { %v312_v29 = vpop.f32.mrf.mxu3 }
 0x159   :  { %v313_v30 = vadd.f32 %v674_v19, %v312_v29  ;;  %v342_v31 = vmul.f32 %v680_v22, %v323_v26  ;;  %v493_v19 = vld [vmem:[#allocation2] ss:$0 sm:$0xff] }
 0x15b   :  { %v330_v33 = vmax.f32 %v313_v30, 0.0  ;;  %v375_v34 = vsel %vm350_vm2, %v342_v31, 0.0 }
 0x15c   :  { %376 = vadd.xlane.f32.xlu2 %v375_v34  ;;  %391 = vadd.xlane.f32.xlu1 %v390_v35 }
 0x15d   :  { %v349_v36 = vmul.f32 %v680_v22, %v330_v33 }
 0x15f   :  { %v396_v38 = vsel %vm350_vm2, %v349_v36, 0.0 }
 0x160   :  { %397 = vadd.xlane.f32.xlu0 %v396_v38 }
 0x164   :  { %394 = vadd.xlane.f32.xlu2 %v393_v39 }
 0x18f   :  { %v353_v40 = vpop.xlane.xlu0 %352 }
 0x190   :  { %v403_v41 = vadd.f32 %v493_v19, %v353_v40 }
 0x192   :  { %420 = vst.msk [vmem:[%s803_s7] sm:$0xff] %vm419_vm3, %v403_v41 }
 0x197   :  { %v356_v42 = vpop.xlane.xlu0 %355 }
 0x198   :  { %v404_v43 = vadd.f32 %v493_v19, %v356_v42 }
 0x19a   :  { %421 = vst.msk [vmem:[%s803_s7 + $0x8] sm:$0xff] %vm419_vm3, %v404_v43 }
 0x19f   :  { %v359_v22 = vpop.xlane.xlu1 %358 }
 0x1a0   :  { %v405_v44 = vadd.f32 %v493_v19, %v359_v22 }
 0x1a2   :  { %422 = vst.msk [vmem:[%s803_s7 + $0x10] sm:$0xff] %vm419_vm3, %v405_v44 }
 0x1a3   :  { %v380_v45 = vpop.xlane.xlu0 %379 }
 0x1a4   :  { %v412_v46 = vadd.f32 %v493_v19, %v380_v45 }
 0x1a6   :  { %429 = vst.msk [vmem:[%s803_s7 + $0x48] sm:$0xff] %vm419_vm3, %v412_v46 }
 0x1a7   :  { %v362_v47 = vpop.xlane.xlu1 %361 }
 0x1a8   :  { %v406_v48 = vadd.f32 %v493_v19, %v362_v47 }
 0x1aa   :  { %423 = vst.msk [vmem:[%s803_s7 + $0x18] sm:$0xff] %vm419_vm3, %v406_v48 }
 0x1af   :  { %v365_v49 = vpop.xlane.xlu2 %364  ;;  %v383_v50 = vpop.xlane.xlu1 %382 }
 0x1b0   :  { %v407_v51 = vadd.f32 %v493_v19, %v365_v49  ;;  %v413_v52 = vadd.f32 %v493_v19, %v383_v50 }
 0x1b2   :  { %424 = vst.msk [vmem:[%s803_s7 + $0x20] sm:$0xff] %vm419_vm3, %v407_v51 }
 0x1b3   :  { %430 = vst.msk [vmem:[%s803_s7 + $0x50] sm:$0xff] %vm419_vm3, %v413_v52 }
 0x1b7   :  { %v386_v53 = vpop.xlane.xlu2 %385 }
 0x1b8   :  { %v414_v54 = vadd.f32 %v493_v19, %v386_v53 }
 0x1ba   :  { %431 = vst.msk [vmem:[%s803_s7 + $0x58] sm:$0xff] %vm419_vm3, %v414_v54 }
 0x1bb   :  { %v389_v55 = vpop.xlane.xlu0 %388 }
 0x1bc   :  { %v415_v56 = vadd.f32 %v493_v19, %v389_v55 }
 0x1be   :  { %432 = vst.msk [vmem:[%s803_s7 + $0x60] sm:$0xff] %vm419_vm3, %v415_v56 }
 0x1bf   :  { %v368_v57 = vpop.xlane.xlu2 %367 }
 0x1c0   :  { %v408_v58 = vadd.f32 %v493_v19, %v368_v57 }
 0x1c2   :  { %425 = vst.msk [vmem:[%s803_s7 + $0x28] sm:$0xff] %vm419_vm3, %v408_v58 }
 0x1c3   :  { %v371_v59 = vpop.xlane.xlu0 %370 }
 0x1c4   :  { %v409_v60 = vadd.f32 %v493_v19, %v371_v59 }
 0x1c6   :  { %426 = vst.msk [vmem:[%s803_s7 + $0x30] sm:$0xff] %vm419_vm3, %v409_v60 }
 0x1c7   :  { %v374_v61 = vpop.xlane.xlu1 %373 }
 0x1c8   :  { %v410_v62 = vadd.f32 %v493_v19, %v374_v61 }
 0x1ca   :  { %427 = vst.msk [vmem:[%s803_s7 + $0x38] sm:$0xff] %vm419_vm3, %v410_v62 }
 0x1cf   :  { %v377_v63 = vpop.xlane.xlu2 %376  ;;  %v392_v0 = vpop.xlane.xlu1 %391 }
 0x1d0   :  { %v411_v1 = vadd.f32 %v493_v19, %v377_v63  ;;  %v416_v2 = vadd.f32 %v493_v19, %v392_v0 }
 0x1d2   :  { %428 = vst.msk [vmem:[%s803_s7 + $0x40] sm:$0xff] %vm419_vm3, %v411_v1 }
 0x1d3   :  { %433 = vst.msk [vmem:[%s803_s7 + $0x68] sm:$0xff] %vm419_vm3, %v416_v2  ;;  %v398_v3 = vpop.xlane.xlu0 %397 }
 0x1d4   :  { %v418_v4 = vadd.f32 %v493_v19, %v398_v3 }
 0x1d6   :  { %435 = vst.msk [vmem:[%s803_s7 + $0x78] sm:$0xff] %vm419_vm3, %v418_v4 }
 0x1d7   :  { %v395_v5 = vpop.xlane.xlu2 %394 }
 0x1d8   :  { %v417_v6 = vadd.f32 %v493_v19, %v395_v5 }
 0x1da   :  { %434 = vst.msk [vmem:[%s803_s7 + $0x70] sm:$0xff] %vm419_vm3, %v417_v6 }

</bundles_post_ra>
